<compile_context>
chip_gen: v7x
topology: tpu7x:2x2x1
jax: 0.10.0
libtpu: 0.0.40
codegen_flags: <defaults>
</compile_context>

<pallas_src>
import math

import jax
import jax.numpy as jnp
from jax.experimental import pallas as pl
from jax.experimental.pallas import tpu as pltpu

_LOG2PI = math.log(2.0 * math.pi)


def _round_up(n, m):
    return ((n + m - 1) // m) * m


def _choose_tile(batch, max_tile, min_tiles):
    """Batch tile (multiple of 128, for the lane axis of the transposed output)
    and tile count, aiming for >= min_tiles balanced grid steps (v7x megacore)."""
    max_tile = max(128, _round_up(max_tile, 128))
    min_tiles = max(1, min_tiles)
    tb = min(max_tile, _round_up(max(-(-batch // min_tiles), 1), 128))
    n_tiles = max(1, -(-batch // tb))
    tb = min(tb, _round_up(-(-batch // n_tiles), 128))   # balance the tiles
    n_tiles = max(1, -(-batch // tb))
    return tb, n_tiles


# ------------------------------ kernels ------------------------------------


def _encode(x_refs, w1_refs, b1_ref):
    """Fused per-input encoders: sum_i (tb, d_i) @ (d_i, n*32) block matmuls.
    Each w1_i is zero outside columns [32*i, 32*(i+1)), so the sum equals the
    concat-then-block-diagonal-matmul of the reference module."""
    acc = None
    for xr, wr in zip(x_refs, w1_refs):
        d = jnp.dot(xr[...].astype(wr.dtype), wr[...],
                    preferred_element_type=jnp.float32)
        acc = d if acc is None else acc + d
    return acc + b1_ref[...]


def _make_mean_kernel(n, out_rows):
    """Inference path: transposed, sublane-packed mean output (out_rows, tb)."""
    def kernel(*refs):
        x_refs = refs[:n]
        w1_refs = refs[n:2 * n]
        b1_ref, w2_ref, b2_ref, wm_ref, bm_ref, out_ref = refs[2 * n:]

        h1 = jnp.tanh(_encode(x_refs, w1_refs, b1_ref))
        h2 = jnp.tanh(jnp.dot(h1.astype(w2_ref.dtype), w2_ref[...],
                              preferred_element_type=jnp.float32) + b2_ref[...])
        mean_full = jnp.dot(h2.astype(wm_ref.dtype), wm_ref[...],
                            preferred_element_type=jnp.float32) + bm_ref[...]
        # XLU transpose (idle slot); store only the useful sublane rows ->
        # lane-dense (out_rows, tb) writeback instead of a (tb, 128) slab.
        out_ref[...] = jnp.transpose(mean_full)[:out_rows, :]
    return kernel


def _make_train_kernel(n, act_dim, out_rows):
    """Training path: rows 0..act_dim-1 = mean^T, row act_dim = logp."""
    def kernel(*refs):
        x_refs = refs[:n]
        a_ref = refs[n]
        w1_refs = refs[n + 1:2 * n + 1]
        (b1_ref, w2_ref, b2_ref, wm_ref, bm_ref,
         inv2v_ref, logc_ref, onehot_ref, out_ref) = refs[2 * n + 1:]

        h1 = jnp.tanh(_encode(x_refs, w1_refs, b1_ref))
        h2 = jnp.tanh(jnp.dot(h1.astype(w2_ref.dtype), w2_ref[...],
                              preferred_element_type=jnp.float32) + b2_ref[...])
        # wm/bm are zero-padded beyond act_dim, so lanes >= act_dim are 0.
        mean_full = jnp.dot(h2.astype(wm_ref.dtype), wm_ref[...],
                            preferred_element_type=jnp.float32) + bm_ref[...]

        # Normal(mean, std) log_prob; 1/(2*var) and (log_std + 0.5*log2pi) are
        # precomputed per-lane in the wrapper.  All elementwise math in f32.
        diff = a_ref[...] - mean_full[:, :act_dim]
        logp = jnp.sum(-(diff * diff) * inv2v_ref[...] - logc_ref[...],
                       axis=-1, keepdims=True)                    # (tb, 1)

        # Pack logp into lane `act_dim` (zero lane of mean_full) using the
        # precomputed one-hot (hoisted out of the kernel), then transpose so
        # the store is a lane-dense (out_rows, tb) block.
        packed = mean_full + logp * onehot_ref[...]
        out_ref[...] = jnp.transpose(packed)[:out_rows, :]
    return kernel


# ------------------------------ wrapper -------------------------------------


def prepare_actor_params(params, *, dot_dtype=jnp.bfloat16):
    """One-time kernel-ready weight prep (bf16 cast, zero-padding, per-lane
    constants).  Done outside the hot path per the perf review."""
    encoders = params["encoders"]          # list of (w_i (d_i,32), b_i (32,))
    n = len(encoders)
    n32 = 32 * n
    act_dim = params["wm"].shape[1]

    out_rows = _round_up(act_dim + 1, 8)                # sublane-packed rows
    out_w = _round_up(max(act_dim + 1, 8), 128)         # lane-padded mean head
    assert act_dim + 1 <= out_rows <= out_w, "act_dim too large for packing"

    w1_blocks, b1_cols = [], []
    for i, (w, b) in enumerate(encoders):
        d = w.shape[0]
        blk = jnp.zeros((d, n32), jnp.float32).at[:, 32 * i:32 * (i + 1)].set(w)
        w1_blocks.append(blk.astype(dot_dtype))
        b1_cols.append(b.reshape(1, 32).astype(jnp.float32))
    b1 = jnp.concatenate(b1_cols, axis=-1)                         # (1, n32)

    # Mean head padded to a full 128-lane output; lanes >= act_dim MUST be zero
    # (the logp packing relies on it).
    wm_pad = (jnp.zeros((32, out_w), jnp.float32)
              .at[:, :act_dim].set(params["wm"]).astype(dot_dtype))
    bm_pad = (jnp.zeros((1, out_w), jnp.float32)
              .at[:, :act_dim].set(params["bm"].reshape(1, act_dim)))

    log_std = params["log_std"].reshape(1, act_dim).astype(jnp.float32)
    std = jnp.exp(log_std)[0]                                      # (act_dim,)
    inv2v = 0.5 * jnp.exp(-2.0 * log_std)                          # 1/(2*var)
    logc = log_std + 0.5 * _LOG2PI                                 # log_std + 0.5*log(2*pi)
    onehot = (jnp.arange(out_w) == act_dim).astype(jnp.float32).reshape(1, out_w)
    # entropy of Normal(mean, std) depends only on log_std (a parameter), so the
    # mean over the broadcast (B, act_dim) equals the mean over (1, act_dim).
    entropy = jnp.mean(0.5 + 0.5 * _LOG2PI + log_std)

    return dict(
        n=n, act_dim=act_dim, out_rows=out_rows, out_w=out_w,
        obs_dims=tuple(int(w.shape[0]) for w, _ in encoders),
        w1_blocks=w1_blocks, b1=b1,
        w2=params["w2"].astype(dot_dtype), b2=params["b2"].reshape(1, 32),
        wm_pad=wm_pad, bm_pad=bm_pad,
        inv2v=inv2v, logc=logc, onehot=onehot,
        std=std, entropy=entropy,
    )


def actor_forward(obs_list, kp, action=None, *, max_batch_tile=2048,
                  min_grid_tiles=4):
    """Returns (mean, std) if action is None, else ((mean, std), logp, entropy)."""
    xs = [o if o.ndim == 2 else o[None, :] for o in obs_list]
    n = kp["n"]
    assert len(xs) == n and all(x.shape[1] == d for x, d in zip(xs, kp["obs_dims"]))
    B = xs[0].shape[0]
    act_dim, out_rows, out_w = kp["act_dim"], kp["out_rows"], kp["out_w"]
    n32 = kp["b1"].shape[1]
    total = sum(kp["obs_dims"])

    tb, n_tiles = _choose_tile(B, max_batch_tile, min_grid_tiles)
    b_out = n_tiles * tb
    grid = (n_tiles,)

    def row_spec(width):                    # batch-tiled arrays (ragged last tile ok)
        return pl.BlockSpec((tb, width), lambda i: (i, 0))

    def full_spec(arr):                     # weights / constants: resident
        return pl.BlockSpec(arr.shape, lambda i: (0, 0))

    out_spec = pl.BlockSpec((out_rows, tb), lambda i: (0, i))
    out_shape = jax.ShapeDtypeStruct((out_rows, b_out), jnp.float32)

    cparams = pltpu.CompilerParams(
        dimension_semantics=("parallel",),       # shard batch tiles across TCs (v7x)
        vmem_limit_bytes=32 * 1024 * 1024,       # <=~16 MiB used even at tb=2048
    )

    weights = list(kp["w1_blocks"]) + [kp["b1"], kp["w2"], kp["b2"],
                                       kp["wm_pad"], kp["bm_pad"]]
    weight_specs = [full_spec(w) for w in weights]

    matmul_flops = 2 * b_out * (total * n32 + n32 * 32 + 32 * out_w)
    weight_bytes = 2 * n32 * (total + 32) + 2 * 32 * out_w + 4 * (n32 + 32 + out_w)
    obs_bytes = sum(int(x.dtype.itemsize) * b_out * d
                    for x, d in zip(xs, kp["obs_dims"]))
    out_bytes = 4 * out_rows * b_out

    if action is None:
        cost = pl.CostEstimate(flops=matmul_flops,
                               transcendentals=b_out * (n32 + 32),
                               bytes_accessed=obs_bytes + weight_bytes + out_bytes)
        packed = pl.pallas_call(
            _make_mean_kernel(n, out_rows),
            out_shape=out_shape,
            grid=grid,
            in_specs=[row_spec(d) for d in kp["obs_dims"]] + weight_specs,
            out_specs=out_spec,
            compiler_params=cparams,
            cost_estimate=cost,
        )(*xs, *weights)
        mean = packed[:act_dim, :B].T                      # tiny, row-contiguous slices
        return mean, kp["std"]

    a = action if action.ndim == 2 else action[None, :]
    a = a.astype(jnp.float32)
    extra = [kp["inv2v"], kp["logc"], kp["onehot"]]

    cost = pl.CostEstimate(flops=matmul_flops + 6 * b_out * act_dim,
                           transcendentals=b_out * (n32 + 32),
                           bytes_accessed=obs_bytes + 4 * b_out * act_dim
                                          + weight_bytes + out_bytes)
    packed = pl.pallas_call(
        _make_train_kernel(n, act_dim, out_rows),
        out_shape=out_shape,
        grid=grid,
        in_specs=[row_spec(d) for d in kp["obs_dims"]] + [row_spec(act_dim)]
                 + weight_specs + [full_spec(e) for e in extra],
        out_specs=out_spec,
        compiler_params=cparams,
        cost_estimate=cost,
    )(*xs, a, *weights, *extra)

    mean = packed[:act_dim, :B].T
    logp = packed[act_dim, :B]
    return (mean, kp["std"]), logp, kp["entropy"]


# ------------------------------ params / reference --------------------------


def init_actor_params(key, obs_dims, act_dim):
    """Deterministic init mimicking nn.Linear default U(-1/sqrt(fan_in), 1/sqrt(fan_in))."""
    n = len(obs_dims)
    keys = jax.random.split(key, 2 * n + 4)

    encoders = []
    for i, d in enumerate(obs_dims):
        bound = 1.0 / math.sqrt(d)
        w = jax.random.uniform(keys[2 * i], (d, 32), jnp.float32, -bound, bound)
        b = jax.random.uniform(keys[2 * i + 1], (32,), jnp.float32, -bound, bound)
        encoders.append((w, b))

    bound = 1.0 / math.sqrt(n * 32)
    w2 = jax.random.uniform(keys[2 * n], (n * 32, 32), jnp.float32, -bound, bound)
    b2 = jax.random.uniform(keys[2 * n + 1], (32,), jnp.float32, -bound, bound)

    bound = 1.0 / math.sqrt(32)
    wm = jax.random.uniform(keys[2 * n + 2], (32, act_dim), jnp.float32, -bound, bound)
    bm = jax.random.uniform(keys[2 * n + 3], (act_dim,), jnp.float32, -bound, bound)

    log_std = jnp.zeros((act_dim,), jnp.float32)   # nn.Parameter(torch.zeros(act_dim))
    return dict(encoders=encoders, w2=w2, b2=b2, wm=wm, bm=bm, log_std=log_std)


def _reference_forward(obs_list, params, action):
    """Pure-JAX f32 reference mirroring the PyTorch module."""
    encs = [jnp.tanh(o @ w + b) for o, (w, b) in zip(obs_list, params["encoders"])]
    h = jnp.tanh(jnp.concatenate(encs, axis=-1) @ params["w2"] + params["b2"])
    mean = h @ params["wm"] + params["bm"]
    log_std = params["log_std"]
    std = jnp.exp(log_std)
    logp = jnp.sum(-((action - mean) ** 2) / (2.0 * std * std)
                   - log_std - 0.5 * _LOG2PI, axis=-1)
    ent = jnp.mean(jnp.broadcast_to(0.5 + 0.5 * _LOG2PI + log_std, mean.shape))
    return mean, std, logp, ent


if __name__ == "__main__":
    obs_dims = [6, 8, 10]   # Actor(obs_dim=[6, 8, 10], act_dim=4)
    act_dim = 4
    B = 2

    key = jax.random.PRNGKey(0)
    kp_key, *data_keys = jax.random.split(key, 1 + len(obs_dims) + 1)
    params = init_actor_params(kp_key, obs_dims, act_dim)
    kparams = prepare_actor_params(params)   # one-time bf16/padded weight prep

    obs = [jax.random.normal(data_keys[i], (B, d), jnp.float32)
           for i, d in enumerate(obs_dims)]
    action = jax.random.normal(data_keys[-1], (B, act_dim), jnp.float32)

    # action=None path: distribution parameters (mean, std)
    mean0, std0 = actor_forward(obs, kparams, action=None)
    jax.block_until_ready((mean0, std0))

    # action given path: (dist params, logp, entropy)
    (mean, std), logp, ent = actor_forward(obs, kparams, action=action)
    jax.block_until_ready((mean, std, logp, ent))

    # sanity check against pure-JAX f32 reference
    r_mean, r_std, r_logp, r_ent = _reference_forward(obs, params, action)
    assert mean0.shape == (B, act_dim) and logp.shape == (B,)
    # both kernels compute mean with the same ops -> should agree tightly
    assert jnp.allclose(mean0, mean, atol=1e-4), "mean kernels disagree"
    # bf16 MXU operands -> loosened tolerances vs the exact f32 reference
    assert jnp.allclose(mean0, r_mean, atol=5e-2), "mean (inference) mismatch"
    assert jnp.allclose(mean, r_mean, atol=5e-2), "mean mismatch"
    assert jnp.allclose(std0, r_std, atol=1e-6), "std (inference) mismatch"
    assert jnp.allclose(std, r_std, atol=1e-6), "std mismatch"
    assert jnp.allclose(logp, r_logp, atol=3e-1), "logp mismatch"
    assert jnp.allclose(ent, r_ent, atol=1e-6), "entropy mismatch"

    print("KERNEL_OK")
</pallas_src>

<mosaic_0001>
module attributes {stable_mosaic.version = 11 : i64} {
  func.func @kernel(%arg0: i32, %arg1: memref<128x6xf32, #tpu.memory_space<vmem>>, %arg2: memref<128x8xf32, #tpu.memory_space<vmem>>, %arg3: memref<128x10xf32, #tpu.memory_space<vmem>>, %arg4: memref<6x96xbf16, #tpu.memory_space<vmem>>, %arg5: memref<8x96xbf16, #tpu.memory_space<vmem>>, %arg6: memref<10x96xbf16, #tpu.memory_space<vmem>>, %arg7: memref<1x96xf32, #tpu.memory_space<vmem>>, %arg8: memref<96x32xbf16, #tpu.memory_space<vmem>>, %arg9: memref<1x32xf32, #tpu.memory_space<vmem>>, %arg10: memref<32x128xbf16, #tpu.memory_space<vmem>>, %arg11: memref<1x128xf32, #tpu.memory_space<vmem>>, %arg12: memref<8x128xf32, #tpu.memory_space<vmem>>) attributes {dimension_semantics = [#tpu.dimension_semantics<parallel>], iteration_bounds = array<i64: 1>, scalar_prefetch = 0 : i64, scratch_operands = 0 : i64, tpu.core_type = #tpu.core_type<tc>, window_params = [{transform_indices = @transform_0, window_bounds = array<i64: 128, 6>}, {transform_indices = @transform_1, window_bounds = array<i64: 128, 8>}, {transform_indices = @transform_2, window_bounds = array<i64: 128, 10>}, {pipeline_mode = #tpu.pipeline_mode<synchronous>, transform_indices = @transform_3, window_bounds = array<i64: 6, 96>}, {pipeline_mode = #tpu.pipeline_mode<synchronous>, transform_indices = @transform_4, window_bounds = array<i64: 8, 96>}, {pipeline_mode = #tpu.pipeline_mode<synchronous>, transform_indices = @transform_5, window_bounds = array<i64: 10, 96>}, {pipeline_mode = #tpu.pipeline_mode<synchronous>, transform_indices = @transform_6, window_bounds = array<i64: 1, 96>}, {pipeline_mode = #tpu.pipeline_mode<synchronous>, transform_indices = @transform_7, window_bounds = array<i64: 96, 32>}, {pipeline_mode = #tpu.pipeline_mode<synchronous>, transform_indices = @transform_8, window_bounds = array<i64: 1, 32>}, {pipeline_mode = #tpu.pipeline_mode<synchronous>, transform_indices = @transform_9, window_bounds = array<i64: 32, 128>}, {pipeline_mode = #tpu.pipeline_mode<synchronous>, transform_indices = @transform_10, window_bounds = array<i64: 1, 128>}, {transform_indices = @transform_11, window_bounds = array<i64: 8, 128>}]} {
    %c0 = arith.constant 0 : index
    %c0_0 = arith.constant 0 : index
    %0 = vector.load %arg1[%c0, %c0_0] : memref<128x6xf32, #tpu.memory_space<vmem>>, vector<128x6xf32>
    %1 = arith.truncf %0 : vector<128x6xf32> to vector<128x6xbf16>
    %c0_1 = arith.constant 0 : index
    %c0_2 = arith.constant 0 : index
    %2 = vector.load %arg4[%c0_1, %c0_2] : memref<6x96xbf16, #tpu.memory_space<vmem>>, vector<6x96xbf16>
    %cst = arith.constant dense<0.000000e+00> : vector<128x96xf32>
    %3 = tpu.matmul %1, %2, %cst {dimension_numbers = #tpu.dot_dimension_numbers<[1], [0], [0], [1], [0, 0, 1, 1], [], []>} : vector<128x6xbf16>, vector<6x96xbf16>, vector<128x96xf32> -> vector<128x96xf32>
    %c0_3 = arith.constant 0 : index
    %c0_4 = arith.constant 0 : index
    %4 = vector.load %arg2[%c0_3, %c0_4] : memref<128x8xf32, #tpu.memory_space<vmem>>, vector<128x8xf32>
    %5 = arith.truncf %4 : vector<128x8xf32> to vector<128x8xbf16>
    %c0_5 = arith.constant 0 : index
    %c0_6 = arith.constant 0 : index
    %6 = vector.load %arg5[%c0_5, %c0_6] : memref<8x96xbf16, #tpu.memory_space<vmem>>, vector<8x96xbf16>
    %cst_7 = arith.constant dense<0.000000e+00> : vector<128x96xf32>
    %7 = tpu.matmul %5, %6, %cst_7 {dimension_numbers = #tpu.dot_dimension_numbers<[1], [0], [0], [1], [0, 0, 1, 1], [], []>} : vector<128x8xbf16>, vector<8x96xbf16>, vector<128x96xf32> -> vector<128x96xf32>
    %8 = arith.addf %3, %7 : vector<128x96xf32>
    %c0_8 = arith.constant 0 : index
    %c0_9 = arith.constant 0 : index
    %9 = vector.load %arg3[%c0_8, %c0_9] : memref<128x10xf32, #tpu.memory_space<vmem>>, vector<128x10xf32>
    %10 = arith.truncf %9 : vector<128x10xf32> to vector<128x10xbf16>
    %c0_10 = arith.constant 0 : index
    %c0_11 = arith.constant 0 : index
    %11 = vector.load %arg6[%c0_10, %c0_11] : memref<10x96xbf16, #tpu.memory_space<vmem>>, vector<10x96xbf16>
    %cst_12 = arith.constant dense<0.000000e+00> : vector<128x96xf32>
    %12 = tpu.matmul %10, %11, %cst_12 {dimension_numbers = #tpu.dot_dimension_numbers<[1], [0], [0], [1], [0, 0, 1, 1], [], []>} : vector<128x10xbf16>, vector<10x96xbf16>, vector<128x96xf32> -> vector<128x96xf32>
    %13 = arith.addf %8, %12 : vector<128x96xf32>
    %c0_13 = arith.constant 0 : index
    %c0_14 = arith.constant 0 : index
    %14 = vector.load %arg7[%c0_13, %c0_14] : memref<1x96xf32, #tpu.memory_space<vmem>>, vector<1x96xf32>
    %15 = vector.broadcast %14 : vector<1x96xf32> to vector<128x96xf32>
    %16 = arith.addf %13, %15 : vector<128x96xf32>
    %17 = math.tanh %16 : vector<128x96xf32>
    %18 = arith.truncf %17 : vector<128x96xf32> to vector<128x96xbf16>
    %c0_15 = arith.constant 0 : index
    %c0_16 = arith.constant 0 : index
    %19 = vector.load %arg8[%c0_15, %c0_16] : memref<96x32xbf16, #tpu.memory_space<vmem>>, vector<96x32xbf16>
    %cst_17 = arith.constant dense<0.000000e+00> : vector<128x32xf32>
    %20 = tpu.matmul %18, %19, %cst_17 {dimension_numbers = #tpu.dot_dimension_numbers<[1], [0], [0], [1], [0, 0, 1, 1], [], []>} : vector<128x96xbf16>, vector<96x32xbf16>, vector<128x32xf32> -> vector<128x32xf32>
    %c0_18 = arith.constant 0 : index
    %c0_19 = arith.constant 0 : index
    %21 = vector.load %arg9[%c0_18, %c0_19] : memref<1x32xf32, #tpu.memory_space<vmem>>, vector<1x32xf32>
    %22 = vector.broadcast %21 : vector<1x32xf32> to vector<128x32xf32>
    %23 = arith.addf %20, %22 : vector<128x32xf32>
    %24 = math.tanh %23 : vector<128x32xf32>
    %25 = arith.truncf %24 : vector<128x32xf32> to vector<128x32xbf16>
    %c0_20 = arith.constant 0 : index
    %c0_21 = arith.constant 0 : index
    %26 = vector.load %arg10[%c0_20, %c0_21] : memref<32x128xbf16, #tpu.memory_space<vmem>>, vector<32x128xbf16>
    %cst_22 = arith.constant dense<0.000000e+00> : vector<128x128xf32>
    %27 = tpu.matmul %25, %26, %cst_22 {dimension_numbers = #tpu.dot_dimension_numbers<[1], [0], [0], [1], [0, 0, 1, 1], [], []>} : vector<128x32xbf16>, vector<32x128xbf16>, vector<128x128xf32> -> vector<128x128xf32>
    %c0_23 = arith.constant 0 : index
    %c0_24 = arith.constant 0 : index
    %28 = vector.load %arg11[%c0_23, %c0_24] : memref<1x128xf32, #tpu.memory_space<vmem>>, vector<1x128xf32>
    %29 = vector.broadcast %28 : vector<1x128xf32> to vector<128x128xf32>
    %30 = arith.addf %27, %29 : vector<128x128xf32>
    %31 = tpu.transpose %30, [1, 0] : vector<128x128xf32> -> vector<128x128xf32>
    %32 = vector.extract_strided_slice %31 {offsets = [0, 0], sizes = [8, 128], strides = [1, 1]} : vector<128x128xf32> to vector<8x128xf32>
    %c0_25 = arith.constant 0 : index
    %c0_26 = arith.constant 0 : index
    %33 = vector.load %arg12[%c0_25, %c0_26] : memref<8x128xf32, #tpu.memory_space<vmem>>, vector<8x128xf32>
    tpu.vector_store %arg12[%c0_25, %c0_26], %32 {strides = array<i32>} : memref<8x128xf32, #tpu.memory_space<vmem>>, vector<8x128xf32>,
    return
  }
  func.func @transform_0(%arg0: i32) -> (i32, i32) {
    %c0_i32 = arith.constant 0 : i32
    %c0_i32_0 = arith.constant 0 : i32
    return %arg0, %c0_i32 : i32, i32
  }
  func.func @transform_1(%arg0: i32) -> (i32, i32) {
    %c0_i32 = arith.constant 0 : i32
    %c0_i32_0 = arith.constant 0 : i32
    return %arg0, %c0_i32 : i32, i32
  }
  func.func @transform_2(%arg0: i32) -> (i32, i32) {
    %c0_i32 = arith.constant 0 : i32
    %c0_i32_0 = arith.constant 0 : i32
    return %arg0, %c0_i32 : i32, i32
  }
  func.func @transform_3(%arg0: i32) -> (i32, i32) {
    %c0_i32 = arith.constant 0 : i32
    %c0_i32_0 = arith.constant 0 : i32
    %c0_i32_1 = arith.constant 0 : i32
    return %c0_i32, %c0_i32_0 : i32, i32
  }
  func.func @transform_4(%arg0: i32) -> (i32, i32) {
    %c0_i32 = arith.constant 0 : i32
    %c0_i32_0 = arith.constant 0 : i32
    %c0_i32_1 = arith.constant 0 : i32
    return %c0_i32, %c0_i32_0 : i32, i32
  }
  func.func @transform_5(%arg0: i32) -> (i32, i32) {
    %c0_i32 = arith.constant 0 : i32
    %c0_i32_0 = arith.constant 0 : i32
    %c0_i32_1 = arith.constant 0 : i32
    return %c0_i32, %c0_i32_0 : i32, i32
  }
  func.func @transform_6(%arg0: i32) -> (i32, i32) {
    %c0_i32 = arith.constant 0 : i32
    %c0_i32_0 = arith.constant 0 : i32
    %c0_i32_1 = arith.constant 0 : i32
    return %c0_i32, %c0_i32_0 : i32, i32
  }
  func.func @transform_7(%arg0: i32) -> (i32, i32) {
    %c0_i32 = arith.constant 0 : i32
    %c0_i32_0 = arith.constant 0 : i32
    %c0_i32_1 = arith.constant 0 : i32
    return %c0_i32, %c0_i32_0 : i32, i32
  }
  func.func @transform_8(%arg0: i32) -> (i32, i32) {
    %c0_i32 = arith.constant 0 : i32
    %c0_i32_0 = arith.constant 0 : i32
    %c0_i32_1 = arith.constant 0 : i32
    return %c0_i32, %c0_i32_0 : i32, i32
  }
  func.func @transform_9(%arg0: i32) -> (i32, i32) {
    %c0_i32 = arith.constant 0 : i32
    %c0_i32_0 = arith.constant 0 : i32
    %c0_i32_1 = arith.constant 0 : i32
    return %c0_i32, %c0_i32_0 : i32, i32
  }
  func.func @transform_10(%arg0: i32) -> (i32, i32) {
    %c0_i32 = arith.constant 0 : i32
    %c0_i32_0 = arith.constant 0 : i32
    %c0_i32_1 = arith.constant 0 : i32
    return %c0_i32, %c0_i32_0 : i32, i32
  }
  func.func @transform_11(%arg0: i32) -> (i32, i32) {
    %c0_i32 = arith.constant 0 : i32
    %c0_i32_0 = arith.constant 0 : i32
    return %c0_i32, %arg0 : i32, i32
  }
}

</mosaic_0001>

<bundles_post_ra>
// kernel: tpu_custom_call.1
= control target key start
LH: loop header
LB: loop body
LE: loop exit
PB: predicated region body
PF: predicated region fallthrough
CT: control target
= control target key end

     0   :  { %vm115_vm0 = vcmask 1043456   ;;  %vm90_vm1 = vcmask 64512   ;;  %vm241_vm2 = vcmask 1042432   ;;  %vm216_vm3 = vcmask 48128   ;;  %s1640_s0 = inlined_call_operand.vmem [shape: f32[2,6], index: 0, kind: input, shape index: {}]   ;;  %s1641_s1 = inlined_call_operand.vmem [shape: f32[2,8], index: 1, kind: input, shape index: {}]   ;;  %s1642_s2 = inlined_call_operand.vmem [shape: f32[2,10], index: 2, kind: input, shape index: {}]   ;;  %s1643_s3 = inlined_call_operand.vmem [shape: bf16[6,96], index: 3, kind: input, shape index: {}]   ;;  %s1644_s4 = inlined_call_operand.vmem [shape: bf16[8,96], index: 4, kind: input, shape index: {}]   ;;  %s1645_s5 = inlined_call_operand.vmem [shape: bf16[10,96], index: 5, kind: input, shape index: {}]   ;;  %s1646_s6 = inlined_call_operand.vmem [shape: f32[1,96], index: 6, kind: input, shape index: {}]   ;;  %s1647_s7 = inlined_call_operand.vmem [shape: bf16[96,32], index: 7, kind: input, shape index: {}]   ;;  %s1648_s8 = inlined_call_operand.vmem [shape: f32[1,32], index: 8, kind: input, shape index: {}]   ;;  %s1649_s9 = inlined_call_operand.vmem [shape: bf16[32,128], index: 9, kind: input, shape index: {}]   ;;  %s1650_s10 = inlined_call_operand.vmem [shape: f32[1,128], index: 10, kind: input, shape index: {}]   ;;  %s1651_s11 = inlined_call_operand.hbm [shape: f32[8,128], index: 11, kind: output, shape index: {}]  }
   0x1   :  { %v89_v0 = vld [vmem:[%s1644_s4] sm:$0xf]  ;;  %v66_v2 = vld [vmem:[%s1641_s1 + $0x8] sm:$0xff]  ;;  %v67_v5 = vld [vmem:[%s1641_s1 + $0x10] sm:$0xff]  ;;  %vm398_vm4 = vcmask 1044480  }
   0x2   :  { %v65_v1 = vld [vmem:[%s1641_s1] sm:$0xff]  ;;  %1206 = vmatprep.subr.msk.bf16.mxu0 %vm115_vm0, %v89_v0  ;;  %v117_v3 = vsel %vm115_vm0, %v89_v0, 0  ;;  %v68_v6 = vld [vmem:[%s1641_s1 + $0x18] sm:$0xff]  ;;  %1207 = vmatprep.subr.msk.bf16.mxu1 %vm115_vm0, %v89_v0  ;;  %v41_v10 = vld [vmem:[%s1640_s0 + $0x8] sm:$0xff] }
   0x3   :  { %v81_v4 = vpack.c.bf16 %v66_v2, %v65_v1  ;;  %v64_v7 = vld [vmem:[%s1643_s3] sm:$0x7]  ;;  %1059 = vmatpush3.bf16.msra.mxu0 %v117_v3  ;;  %v82_v8 = vpack.c.bf16 %v68_v6, %v67_v5  ;;  %1161 = vmatpush3.bf16.msra.mxu1 %v117_v3  ;;  %v42_v14 = vld [vmem:[%s1640_s0 + $0x10] sm:$0xff]  ;;  %v43_v16 = vld [vmem:[%s1640_s0 + $0x18] sm:$0xff] }
   0x4   :  { %v40_v9 = vld [vmem:[%s1640_s0] sm:$0xff]  ;;  %1208 = vmatprep.subr.msk.bf16.mxu0 %vm241_vm2, %v64_v7  ;;  %v243_v11 = vsel %vm241_vm2, %v64_v7, 0  ;;  %v70_v18 = vld [vmem:[%s1641_s1 + $0x28] sm:$0xff]  ;;  %v71_v21 = vld [vmem:[%s1641_s1 + $0x30] sm:$0xff]  ;;  %v57_v26 = vpack.c.bf16 %v43_v16, %v42_v14 }
   0x5   :  { %1060 = vmatprep.mubr.msk.bf16.mxu0 %vm90_vm1, %v81_v4  ;;  %v56_v12 = vpack.c.bf16 %v41_v10, %v40_v9  ;;  %v1211_v13 = vld [vmem:[%s1645_s5] sm:$0x1f]   ;;  %v45_v19 = vld [vmem:[%s1640_s0 + $0x28] sm:$0xff]  ;;  %v72_v22 = vld [vmem:[%s1641_s1 + $0x38] sm:$0xff] }
   0x6   :  { %1061 = vmatmul.mubr.msk.bf16.vlgmr.msra.gmra.mrb[0].mxu0 %vm90_vm1, %v82_v8  ;;  %v69_v15 = vld [vmem:[%s1641_s1 + $0x20] sm:$0xff]  ;;  %v84_v23 = vpack.c.bf16 %v72_v22, %v71_v21  ;;  %v74_v25 = vld [vmem:[%s1641_s1 + $0x48] sm:$0xff]  ;;  %v400_v29 = vsel %vm398_vm4, %v1211_v13, 0  ;;  %v75_v30 = vld [vmem:[%s1641_s1 + $0x50] sm:$0xff] }
   0x7   :  { %1077 = vmatpush3.bf16.msra.mxu0 %v243_v11  ;;  %1078 = vmatprep.mubr.msk.bf16.mxu0 %vm216_vm3, %v56_v12  ;;  %v44_v17 = vld [vmem:[%s1640_s0 + $0x20] sm:$0xff]  ;;  %v83_v20 = vpack.c.bf16 %v70_v18, %v69_v15  ;;  %v76_v31 = vld [vmem:[%s1641_s1 + $0x58] sm:$0xff]  ;;  %v46_v32 = vld [vmem:[%s1640_s0 + $0x30] sm:$0xff] }
   0x8   :  { %1209 = vmatprep.subr.msk.bf16.mxu0 %vm398_vm4, %v1211_v13  ;;  %v73_v24 = vld [vmem:[%s1641_s1 + $0x40] sm:$0xff]  ;;  %v58_v28 = vpack.c.bf16 %v45_v19, %v44_v17  ;;  %v78_v34 = vld [vmem:[%s1641_s1 + $0x68] sm:$0xff]  ;;  %v47_v35 = vld [vmem:[%s1640_s0 + $0x38] sm:$0xff]  ;;  %v86_v37 = vpack.c.bf16 %v76_v31, %v75_v30 }
   0x9   :  { %1064 = vmatprep.mubr.msk.bf16.mxu1 %vm90_vm1, %v83_v20  ;;  %v85_v27 = vpack.c.bf16 %v74_v25, %v73_v24  ;;  %v77_v33 = vld [vmem:[%s1641_s1 + $0x60] sm:$0xff]  ;;  %v49_v39 = vld [vmem:[%s1640_s0 + $0x48] sm:$0xff]  ;;  %v59_v42 = vpack.c.bf16 %v47_v35, %v46_v32  ;;  %v79_v43 = vld [vmem:[%s1641_s1 + $0x70] sm:$0xff] }
   0xa   :  { %1065 = vmatmul.mubr.msk.bf16.vlgmr.msra.gmra.mrb[0].mxu1 %vm90_vm1, %v84_v23  ;;  %v48_v36 = vld [vmem:[%s1640_s0 + $0x40] sm:$0xff]  ;;  %v87_v40 = vpack.c.bf16 %v78_v34, %v77_v33  ;;  %v1213_v41 = vld [vmem:[%s1647_s7 + $0x8] sm:$0xff]   ;;  %v80_v44 = vld [vmem:[%s1641_s1 + $0x78] sm:$0xff] }
   0xb   :  { %1068 = vmatprep.mubr.msk.bf16.mxu1 %vm90_vm1, %v85_v27  ;;  %v1212_v38 = vld [vmem:[%s1647_s7] sm:$0xff]   ;;  %v60_v45 = vpack.c.bf16 %v49_v39, %v48_v36  ;;  %v1214_v46 = vld [vmem:[%s1647_s7 + $0x10] sm:$0xff]  }
   0xc   :  { %1162 = vmatprep.subr.bf16.mxu1 %v1212_v38 }
   0xd   :  { %1168 = vmatpush3.bf16.msra.mxu1 %v1212_v38 }
   0xe   :  { %1163 = vmatprep.subr.bf16.mxu1 %v1213_v41 }
  0x12   :  { %1079 = vmatmul.mubr.msk.bf16.vlgmr.msra.gmra.mrb[0].mxu0 %vm216_vm3, %v57_v26  ;;  %1069 = vmatmul.mubr.msk.bf16.gmra.mrb[4].mxu1 %vm90_vm1, %v86_v37 }
  0x13   :  { %1095 = vmatpush3.bf16.msra.mxu0 %v400_v29  ;;  %1082 = vmatprep.mubr.msk.bf16.mxu0 %vm216_vm3, %v58_v28 }
  0x14   :  { %1112 = vmatprep.subr.bf16.mxu0 %v1212_v38  ;;  %1072 = vmatprep.mubr.msk.bf16.mxu1 %vm90_vm1, %v87_v40 }
  0x15   :  { %16 = vsyncpa [#allocation3], 0  ;;  %1169 = vmatpush3.bf16.msra.mxu1 %v1213_v41  ;;  %v50_v47 = vld [vmem:[%s1640_s0 + $0x50] sm:$0xff]  ;;  %v51_v48 = vld [vmem:[%s1640_s0 + $0x58] sm:$0xff]  ;;  %v88_v49 = vpack.c.bf16 %v80_v44, %v79_v43  ;;  %vm373_vm5 = vcmask 80896   ;;  %vm617_vm6 = vcmask 785408  }
  0x16   :  { %1164 = vmatprep.subr.bf16.mxu1 %v1214_v46  ;;  %v52_v50 = vld [vmem:[%s1640_s0 + $0x60] sm:$0xff]  ;;  %v53_v51 = vld [vmem:[%s1640_s0 + $0x68] sm:$0xff]  ;;  %v61_v52 = vpack.c.bf16 %v51_v48, %v50_v47  ;;  %v54_v54 = vld [vmem:[%s1640_s0 + $0x70] sm:$0xff]  ;;  %vm786_vm7 = vcmask 261120  }
  0x17   :  { %v62_v53 = vpack.c.bf16 %v53_v51, %v52_v50  ;;  %v55_v55 = vld [vmem:[%s1640_s0 + $0x78] sm:$0xff]  ;;  %v342_v56 = vld [vmem:[%s1642_s2] sm:$0xff]  ;;  %v343_v57 = vld [vmem:[%s1642_s2 + $0x8] sm:$0xff] }
  0x18   :  { %v63_v58 = vpack.c.bf16 %v55_v55, %v54_v54  ;;  %v358_v59 = vpack.c.bf16 %v343_v57, %v342_v56  ;;  %v344_v60 = vld [vmem:[%s1642_s2 + $0x10] sm:$0xff]  ;;  %v345_v61 = vld [vmem:[%s1642_s2 + $0x18] sm:$0xff]  ;;  %v346_v62 = vld [vmem:[%s1642_s2 + $0x20] sm:$0xff] }
  0x19   :  { %1170 = vmatpush3.bf16.msra.mxu1 %v1214_v46  ;;  %v347_v63 = vld [vmem:[%s1642_s2 + $0x28] sm:$0xff]  ;;  %v359_v0 = vpack.c.bf16 %v345_v61, %v344_v60  ;;  %v348_v2 = vld [vmem:[%s1642_s2 + $0x30] sm:$0xff]  ;;  %v349_v3 = vld [vmem:[%s1642_s2 + $0x38] sm:$0xff] }
  0x1a   :  { %1083 = vmatmul.mubr.msk.bf16.gmra.mrb[4].mxu0 %vm216_vm3, %v59_v42  ;;  %1073 = vmatmul.mubr.msk.bf16.gmra.mrb[8].mxu1 %vm90_vm1, %v88_v49  ;;  %v360_v1 = vpack.c.bf16 %v347_v63, %v346_v62  ;;  %v350_v4 = vld [vmem:[%s1642_s2 + $0x40] sm:$0xff]  ;;  %v351_v5 = vld [vmem:[%s1642_s2 + $0x48] sm:$0xff]  ;;  %v361_v6 = vpack.c.bf16 %v349_v3, %v348_v2  ;;  %v352_v8 = vld [vmem:[%s1642_s2 + $0x50] sm:$0xff] }
  0x1b   :  { %1086 = vmatprep.mubr.msk.bf16.mxu0 %vm216_vm3, %v60_v45  ;;  %v362_v7 = vpack.c.bf16 %v351_v5, %v350_v4  ;;  %v353_v9 = vld [vmem:[%s1642_s2 + $0x58] sm:$0xff]  ;;  %v354_v10 = vld [vmem:[%s1642_s2 + $0x60] sm:$0xff]  ;;  %v355_v11 = vld [vmem:[%s1642_s2 + $0x68] sm:$0xff] }
  0x1c   :  { %v363_v12 = vpack.c.bf16 %v353_v9, %v352_v8  ;;  %v364_v13 = vpack.c.bf16 %v355_v11, %v354_v10  ;;  %v356_v14 = vld [vmem:[%s1642_s2 + $0x70] sm:$0xff]  ;;  %v357_v15 = vld [vmem:[%s1642_s2 + $0x78] sm:$0xff]  ;;  %v1216_v18 = vld [vmem:[%s1647_s7 + $0x20] sm:$0xff]  }
  0x1d   :  { %v365_v16 = vpack.c.bf16 %v357_v15, %v356_v14  ;;  %v1215_v17 = vld [vmem:[%s1647_s7 + $0x18] sm:$0xff]   ;;  %v1217_v19 = vld [vmem:[%s1647_s7 + $0x28] sm:$0xff]   ;;  %v1569_v20 = vld [vmem:[%s1649_s9] sm:$0xff]  }
  0x1e   :  { %1165 = vmatprep.subr.bf16.mxu1 %v1215_v17  ;;  %v1581_v33 = vld [vmem:[%s1646_s6] ss:$0 sm:$0xff] }
  0x1f   :  { %1171 = vmatpush3.bf16.msra.mxu1 %v1215_v17 }
  0x20   :  { %1166 = vmatprep.subr.bf16.mxu1 %v1216_v18 }
  0x22   :  { %1087 = vmatmul.mubr.msk.bf16.gmra.mrb[8].mxu0 %vm216_vm3, %v61_v52 }
  0x23   :  { %1090 = vmatprep.mubr.msk.bf16.mxu0 %vm216_vm3, %v62_v53  ;;  %1172 = vmatpush3.bf16.msra.mxu1 %v1216_v18 }
  0x24   :  { %1167 = vmatprep.subr.bf16.mxu1 %v1217_v19 }
  0x27   :  { %1173 = vmatpush3.bf16.msra.mxu1 %v1217_v19 }
  0x28   :  { %1140 = vmatprep.subr.bf16.mxu1 %v1569_v20 }
  0x2a   :  { %1091 = vmatmul.mubr.msk.bf16.gmra.mrb[12].mxu0 %vm216_vm3, %v63_v58 }
  0x2b   :  { %1096 = vmatprep.mubr.msk.bf16.mxu0 %vm373_vm5, %v358_v59 }
  0x32   :  { %1097 = vmatmul.mubr.msk.bf16.vlgmr.msra.gmra.mrb[0].mxu0 %vm373_vm5, %v359_v0 }
  0x33   :  { %1100 = vmatprep.mubr.msk.bf16.mxu0 %vm373_vm5, %v360_v1  ;;  %1113 = vmatpush3.bf16.msra.mxu0 %v1212_v38 }
  0x34   :  { %1114 = vmatprep.subr.bf16.mxu0 %v1213_v41 }
  0x37   :  { %1115 = vmatpush3.bf16.msra.mxu0 %v1213_v41 }
  0x38   :  { %1116 = vmatprep.subr.bf16.mxu0 %v1214_v46 }
  0x3a   :  { %1101 = vmatmul.mubr.msk.bf16.gmra.mrb[4].mxu0 %vm373_vm5, %v361_v6 }
  0x3b   :  { %1104 = vmatprep.mubr.msk.bf16.mxu0 %vm373_vm5, %v362_v7  ;;  %1117 = vmatpush3.bf16.msra.mxu0 %v1214_v46 }
  0x3c   :  { %1118 = vmatprep.subr.bf16.mxu0 %v1215_v17 }
  0x3f   :  { %1119 = vmatpush3.bf16.msra.mxu0 %v1215_v17 }
  0x40   :  { %1120 = vmatprep.subr.bf16.mxu0 %v1216_v18 }
  0x42   :  { %1105 = vmatmul.mubr.msk.bf16.gmra.mrb[8].mxu0 %vm373_vm5, %v363_v12 }
  0x43   :  { %1108 = vmatprep.mubr.msk.bf16.mxu0 %vm373_vm5, %v364_v13  ;;  %1121 = vmatpush3.bf16.msra.mxu0 %v1216_v18 }
  0x44   :  { %1122 = vmatprep.subr.bf16.mxu0 %v1217_v19 }
  0x47   :  { %1123 = vmatpush3.bf16.msra.mxu0 %v1217_v19 }
  0x4a   :  { %1109 = vmatmul.mubr.msk.bf16.gmra.mrb[12].mxu0 %vm373_vm5, %v365_v16 }
  0xdd   :  { %v1066_v21 = vpop.f32.mrb[0].mxu1 }
  0xde   :  { %v169_v22 = vpop.f32.mrb[1].mxu1 }
  0xdf   :  { %v1067_v23 = vpop.f32.mrb[2].mxu1 }
  0xe0   :  { %v172_v24 = vpop.f32.mrb[3].mxu1 }
  0xe5   :  { %v1070_v25 = vpop.f32.mrb[4].mxu1 }
  0xe6   :  { %v185_v26 = vpop.f32.mrb[5].mxu1 }
  0xe7   :  { %v1071_v27 = vpop.f32.mrb[6].mxu1 }
  0xe8   :  { %v188_v28 = vpop.f32.mrb[7].mxu1 }
  0xed   :  { %v1074_v29 = vpop.f32.mrb[8].mxu1 }
  0xee   :  { %v1572_v30 = vpop.f32.mrb[9].mxu1 }
  0xef   :  { %v1574_v31 = vpop.f32.mrb[10].mxu1 }
  0xf0   :  { %v1576_v32 = vpop.f32.mrb[11].mxu1 }
 0x105   :  { %v1098_v34 = vpop.f32.mrb[0].mxu0 }
 0x106   :  { %v524_v35 = vadd.f32 %v1098_v34, %v1581_v33  ;;  %v436_v36 = vpop.f32.mrb[1].mxu0 }
 0x107   :  { %v522_v37 = vadd.f32 %v1581_v33, %v436_v36  ;;  %v1099_v38 = vpop.f32.mrb[2].mxu0 }
 0x108   :  { %1220 = vtanh.f32 %v524_v35  ;;  %v525_v39 = vadd.f32 %v1099_v38, %v1581_v33  ;;  %v439_v40 = vpop.f32.mrb[3].mxu0 }
 0x109   :  { %1222 = vtanh.f32 %v522_v37  ;;  %v523_v41 = vadd.f32 %v1581_v33, %v439_v40 }
 0x10a   :  { %1224 = vtanh.f32 %v525_v39  ;;  %v981_v39 = vld [vmem:[%s1648_s8] ss:$0 sm:$0xff] }
 0x10b   :  { %1226 = vtanh.f32 %v523_v41 }
 0x10d   :  { %v1102_v42 = vpop.f32.mrb[4].mxu0 }
 0x10e   :  { %v1174_v43 = vadd.f32 %v1102_v42, %v1066_v21  ;;  %v452_v44 = vpop.f32.mrb[5].mxu0 }
 0x10f   :  { %v1175_v45 = vadd.f32 %v452_v44, %v169_v22  ;;  %v1103_v46 = vpop.f32.mrb[6].mxu0 }
 0x110   :  { %v528_v47 = vadd.f32 %v1174_v43, %v1581_v33  ;;  %v1176_v48 = vadd.f32 %v1103_v46, %v1067_v23  ;;  %v455_v49 = vpop.f32.mrb[7].mxu0 }
 0x111   :  { %v526_v50 = vadd.f32 %v1175_v45, %v1581_v33  ;;  %v1177_v51 = vadd.f32 %v455_v49, %v172_v24 }
 0x112   :  { %v1221_v52 = vpop.eup %1220  ;;  %1228 = vtanh.f32 %v528_v47  ;;  %v529_v53 = vadd.f32 %v1176_v48, %v1581_v33 }
 0x113   :  { %v1223_v54 = vpop.eup %1222  ;;  %1230 = vtanh.f32 %v526_v50  ;;  %v527_v55 = vadd.f32 %v1177_v51, %v1581_v33 }
 0x114   :  { %v1225_v56 = vpop.eup %1224  ;;  %1232 = vtanh.f32 %v529_v53 }
 0x115   :  { %v1227_v57 = vpop.eup %1226  ;;  %v555_v58 = vpack.c.bf16 %v1225_v56, %v1221_v52  ;;  %1234 = vtanh.f32 %v527_v55  ;;  %v1106_v59 = vpop.f32.mrb[8].mxu0 }
 0x116   :  { %v1178_v60 = vadd.f32 %v1106_v59, %v1070_v25  ;;  %v468_v61 = vpop.f32.mrb[9].mxu0  ;;  %v554_v62 = vpack.c.bf16 %v1227_v57, %v1223_v54 }
 0x117   :  { %v1179_v63 = vadd.f32 %v468_v61, %v185_v26  ;;  %v1107_v0 = vpop.f32.mrb[10].mxu0 }
 0x118   :  { %v532_v1 = vadd.f32 %v1178_v60, %v1581_v33  ;;  %v1180_v2 = vadd.f32 %v1107_v0, %v1071_v27  ;;  %v471_v3 = vpop.f32.mrb[11].mxu0  ;;  %1124 = vmatprep.mubr.msk.bf16.mxu0 %vm617_vm6, %v554_v62 }
 0x119   :  { %v530_v4 = vadd.f32 %v1179_v63, %v1581_v33  ;;  %v1181_v5 = vadd.f32 %v471_v3, %v188_v28  ;;  %1125 = vmatmul.mubr.msk.bf16.vlgmr.msra.gmra.mrb[16].mxu0 %vm617_vm6, %v555_v58 }
 0x11a   :  { %1236 = vtanh.f32 %v532_v1  ;;  %v533_v6 = vadd.f32 %v1180_v2, %v1581_v33 }
 0x11b   :  { %1238 = vtanh.f32 %v530_v4  ;;  %v531_v7 = vadd.f32 %v1181_v5, %v1581_v33 }
 0x11c   :  { %v1229_v8 = vpop.eup %1228  ;;  %1240 = vtanh.f32 %v533_v6 }
 0x11d   :  { %v1231_v9 = vpop.eup %1230  ;;  %1242 = vtanh.f32 %v531_v7  ;;  %v1110_v10 = vpop.f32.mrb[12].mxu0 }
 0x11e   :  { %v1233_v11 = vpop.eup %1232  ;;  %v1182_v12 = vadd.f32 %v1110_v10, %v1074_v29  ;;  %v484_v13 = vpop.f32.mrb[13].mxu0 }
 0x11f   :  { %v1235_v14 = vpop.eup %1234  ;;  %v557_v15 = vpack.c.bf16 %v1233_v11, %v1229_v8  ;;  %v1183_v16 = vadd.f32 %v484_v13, %v1572_v30  ;;  %v1111_v17 = vpop.f32.mrb[14].mxu0 }
 0x120   :  { %v536_v18 = vadd.f32 %v1182_v12, %v1581_v33  ;;  %v1184_v19 = vadd.f32 %v1111_v17, %v1574_v31  ;;  %v487_v21 = vpop.f32.mrb[15].mxu0  ;;  %v556_v22 = vpack.c.bf16 %v1235_v14, %v1231_v9 }
 0x121   :  { %v534_v23 = vadd.f32 %v1183_v16, %v1581_v33  ;;  %v1185_v24 = vadd.f32 %v487_v21, %v1576_v32 }
 0x122   :  { %1244 = vtanh.f32 %v536_v18  ;;  %v537_v25 = vadd.f32 %v1184_v19, %v1581_v33  ;;  %1128 = vmatprep.mubr.msk.bf16.mxu1 %vm617_vm6, %v556_v22 }
 0x123   :  { %1246 = vtanh.f32 %v534_v23  ;;  %v535_v26 = vadd.f32 %v1185_v24, %v1581_v33  ;;  %1129 = vmatmul.mubr.msk.bf16.vlgmr.msra.gmra.mrb[12].mxu1 %vm617_vm6, %v557_v15 }
 0x124   :  { %v1237_v27 = vpop.eup %1236  ;;  %1248 = vtanh.f32 %v537_v25  ;;  %1141 = vmatpush3.bf16.msra.mxu1 %v1569_v20  ;;  %v1219_v20 = vld [vmem:[%s1649_s9 + $0x8] sm:$0xff]  }
 0x125   :  { %v1239_v28 = vpop.eup %1238  ;;  %1250 = vtanh.f32 %v535_v26  ;;  %1142 = vmatprep.subr.bf16.mxu1 %v1219_v20 }
 0x126   :  { %v1241_v29 = vpop.eup %1240 }
 0x127   :  { %v1243_v30 = vpop.eup %1242  ;;  %v559_v31 = vpack.c.bf16 %v1241_v29, %v1237_v27 }
 0x128   :  { %v558_v32 = vpack.c.bf16 %v1243_v30, %v1239_v28  ;;  %1143 = vmatpush3.bf16.msra.mxu1 %v1219_v20 }
 0x12a   :  { %1132 = vmatprep.mubr.msk.bf16.mxu1 %vm617_vm6, %v558_v32 }
 0x12b   :  { %1133 = vmatmul.mubr.msk.bf16.gmra.mrb[16].mxu1 %vm617_vm6, %v559_v31 }
 0x12c   :  { %v1245_v34 = vpop.eup %1244 }
 0x12d   :  { %v1247_v35 = vpop.eup %1246 }
 0x12e   :  { %v1249_v36 = vpop.eup %1248 }
 0x12f   :  { %v1251_v33 = vpop.eup %1250  ;;  %v561_v37 = vpack.c.bf16 %v1249_v36, %v1245_v34  ;;  %v996_v34 = vld [vmem:[%s1650_s10] ss:$0 sm:$0xff]  ;;  %s1308_s10 = smov [#allocation2]  }
 0x130   :  { %v560_v38 = vpack.c.bf16 %v1251_v33, %v1247_v35  ;;  %s947_s21 = sshll.u32 %s1308_s10, 4  ;;  %s948_s21 = int_to_ptr.vmem [resolvable:$true] %s947_s21 }
 0x131   :  { %s1284_s22 = scalar_lea.vmem %s948_s21, 128  ;;  %p1289_p1 = scmp.lt.s32.totalorder %s948_s21, %s948_s21 }
 0x132   :  { %1136 = vmatprep.mubr.msk.bf16.mxu1 %vm617_vm6, %v560_v38  ;;  %p1285_p0 = scmp.ne.s32.totalorder %s948_s21, %s1284_s22  ;;  %p1290_p2 = scmp.lt.s32.totalorder %s1284_s22, %s1284_s22 }
 0x133   :  { %1137 = vmatmul.mubr.msk.bf16.gmra.mrb[20].mxu1 %vm617_vm6, %v561_v37 }
 0x134   :  { %p1291_p3 = por %p1290_p2, %p1289_p1 }
 0x136   :  { %p1292_p4 = pnand %p1291_p3, %p1285_p0 }
 0x1ec   :  { %v1126_v40 = vpop.f32.mrb[16].mxu0 }
 0x1ed   :  { %v685_v41 = vadd.f32 %v1126_v40, %v981_v39  ;;  %v676_v42 = vpop.f32.mrb[17].mxu0 }
 0x1ee   :  { %v677_v43 = vadd.f32 %v981_v39, %v676_v42  ;;  %v1127_v44 = vpop.f32.mrb[18].mxu0 }
 0x1ef   :  { %1252 = vtanh.f32 %v685_v41  ;;  %v688_v45 = vadd.f32 %v1127_v44, %v981_v39  ;;  %v679_v46 = vpop.f32.mrb[19].mxu0 }
 0x1f0   :  { %1254 = vtanh.f32 %v677_v43  ;;  %v680_v47 = vadd.f32 %v981_v39, %v679_v46 }
 0x1f1   :  { %1256 = vtanh.f32 %v688_v45 }
 0x1f2   :  { %1258 = vtanh.f32 %v680_v47 }
 0x1f6   :  { %v1130_v48 = vpop.f32.mrb[12].mxu1 }
 0x1f7   :  { %v701_v49 = vadd.f32 %v1130_v48, %v981_v39  ;;  %v692_v50 = vpop.f32.mrb[13].mxu1 }
 0x1f8   :  { %v693_v51 = vadd.f32 %v981_v39, %v692_v50  ;;  %v1131_v52 = vpop.f32.mrb[14].mxu1 }
 0x1f9   :  { %v1253_v53 = vpop.eup %1252  ;;  %1260 = vtanh.f32 %v701_v49  ;;  %v704_v54 = vadd.f32 %v1131_v52, %v981_v39  ;;  %v695_v55 = vpop.f32.mrb[15].mxu1 }
 0x1fa   :  { %v1255_v56 = vpop.eup %1254  ;;  %1262 = vtanh.f32 %v693_v51  ;;  %v696_v57 = vadd.f32 %v981_v39, %v695_v55 }
 0x1fb   :  { %v1257_v58 = vpop.eup %1256  ;;  %1264 = vtanh.f32 %v704_v54 }
 0x1fc   :  { %v1259_v59 = vpop.eup %1258  ;;  %v756_v60 = vpack.c.bf16 %v1257_v58, %v1253_v53  ;;  %1266 = vtanh.f32 %v696_v57 }
 0x1fd   :  { %v755_v61 = vpack.c.bf16 %v1259_v59, %v1255_v56 }
 0x1fe   :  { %v1134_v62 = vpop.f32.mrb[16].mxu1 }
 0x1ff   :  { %v717_v63 = vadd.f32 %v1134_v62, %v981_v39  ;;  %v708_v0 = vpop.f32.mrb[17].mxu1  ;;  %1144 = vmatprep.mubr.msk.bf16.mxu1 %vm786_vm7, %v755_v61 }
 0x200   :  { %v709_v1 = vadd.f32 %v981_v39, %v708_v0  ;;  %v1135_v2 = vpop.f32.mrb[18].mxu1  ;;  %1145 = vmatmul.mubr.msk.bf16.vlgmr.msra.gmra.mrb[24].mxu1 %vm786_vm7, %v756_v60 }
 0x201   :  { %1268 = vtanh.f32 %v717_v63  ;;  %v720_v3 = vadd.f32 %v1135_v2, %v981_v39  ;;  %v711_v4 = vpop.f32.mrb[19].mxu1 }
 0x202   :  { %1270 = vtanh.f32 %v709_v1  ;;  %v712_v5 = vadd.f32 %v981_v39, %v711_v4 }
 0x203   :  { %v1261_v6 = vpop.eup %1260  ;;  %1272 = vtanh.f32 %v720_v3 }
 0x204   :  { %v1263_v7 = vpop.eup %1262  ;;  %1274 = vtanh.f32 %v712_v5 }
 0x205   :  { %v1265_v8 = vpop.eup %1264 }
 0x206   :  { %v1267_v9 = vpop.eup %1266  ;;  %v1138_v10 = vpop.f32.mrb[20].mxu1  ;;  %v758_v11 = vpack.c.bf16 %v1265_v8, %v1261_v6 }
 0x207   :  { %v733_v12 = vadd.f32 %v1138_v10, %v981_v39  ;;  %v724_v13 = vpop.f32.mrb[21].mxu1  ;;  %v757_v14 = vpack.c.bf16 %v1267_v9, %v1263_v7 }
 0x208   :  { %v725_v15 = vadd.f32 %v981_v39, %v724_v13  ;;  %v1139_v16 = vpop.f32.mrb[22].mxu1 }
 0x209   :  { %1276 = vtanh.f32 %v733_v12  ;;  %v736_v17 = vadd.f32 %v1139_v16, %v981_v39  ;;  %v727_v18 = vpop.f32.mrb[23].mxu1  ;;  %1148 = vmatprep.mubr.msk.bf16.mxu1 %vm786_vm7, %v757_v14 }
 0x20a   :  { %1278 = vtanh.f32 %v725_v15  ;;  %v728_v19 = vadd.f32 %v981_v39, %v727_v18  ;;  %1149 = vmatmul.mubr.msk.bf16.gmra.mrb[28].mxu1 %vm786_vm7, %v758_v11 }
 0x20b   :  { %v1269_v21 = vpop.eup %1268  ;;  %1280 = vtanh.f32 %v736_v17 }
 0x20c   :  { %v1271_v22 = vpop.eup %1270  ;;  %1282 = vtanh.f32 %v728_v19 }
 0x20d   :  { %v1273_v23 = vpop.eup %1272 }
 0x20e   :  { %v1275_v24 = vpop.eup %1274  ;;  %v760_v25 = vpack.c.bf16 %v1273_v23, %v1269_v21 }
 0x20f   :  { %v759_v26 = vpack.c.bf16 %v1275_v24, %v1271_v22 }
 0x211   :  { %1152 = vmatprep.mubr.msk.bf16.mxu1 %vm786_vm7, %v759_v26 }
 0x212   :  { %1153 = vmatmul.mubr.msk.bf16.gmra.mrb[32].mxu1 %vm786_vm7, %v760_v25 }
 0x213   :  { %v1277_v27 = vpop.eup %1276 }
 0x214   :  { %v1279_v28 = vpop.eup %1278 }
 0x215   :  { %v1281_v29 = vpop.eup %1280 }
 0x216   :  { %v1283_v30 = vpop.eup %1282  ;;  %v762_v31 = vpack.c.bf16 %v1281_v29, %v1277_v27 }
 0x217   :  { %v761_v32 = vpack.c.bf16 %v1283_v30, %v1279_v28 }
 0x219   :  { %1156 = vmatprep.mubr.msk.bf16.mxu1 %vm786_vm7, %v761_v32 }
 0x21a   :  { %1157 = vmatmul.mubr.msk.bf16.gmra.mrb[36].mxu1 %vm786_vm7, %v762_v31 }
 0x2d3   :  { %v1146_v35 = vpop.f32.mrb[24].mxu1 }
 0x2d4   :  { %v845_v36 = vpop.f32.mrb[25].mxu1  ;;  %v854_v39 = vadd.f32 %v1146_v35, %v996_v34 }
 0x2d5   :  { %v1147_v33 = vpop.f32.mrb[26].mxu1  ;;  %v846_v37 = vadd.f32 %v996_v34, %v845_v36 }
 0x2d6   :  { %v848_v38 = vpop.f32.mrb[27].mxu1  ;;  %v857_v44 = vadd.f32 %v1147_v33, %v996_v34 }
 0x2d7   :  { %908 = vxpose.xlu0.b32.start [1/16] (narrow) %v846_v37, 8  ;;  %v849_v20 = vadd.f32 %v996_v34, %v848_v38 }
 0x2db   :  { %909 = vxpose.xlu0.b32.cont [2/16] (narrow) %v849_v20, 8 }
 0x2dd   :  { %v1150_v40 = vpop.f32.mrb[28].mxu1 }
 0x2de   :  { %v861_v41 = vpop.f32.mrb[29].mxu1  ;;  %v870_v51 = vadd.f32 %v1150_v40, %v996_v34 }
 0x2df   :  { %v1151_v42 = vpop.f32.mrb[30].mxu1  ;;  %910 = vxpose.xlu0.b32.cont [3/16] (narrow) %v854_v39, 8  ;;  %v862_v45 = vadd.f32 %v996_v34, %v861_v41 }
 0x2e0   :  { %v864_v43 = vpop.f32.mrb[31].mxu1  ;;  %v873_v56 = vadd.f32 %v1151_v42, %v996_v34 }
 0x2e1   :  { %v865_v50 = vadd.f32 %v996_v34, %v864_v43 }
 0x2e3   :  { %911 = vxpose.xlu0.b32.cont [4/16] (narrow) %v857_v44, 8 }
 0x2e5   :  { %v1154_v46 = vpop.f32.mrb[32].mxu1 }
 0x2e6   :  { %v877_v47 = vpop.f32.mrb[33].mxu1  ;;  %v886_v59 = vadd.f32 %v1154_v46, %v996_v34 }
 0x2e7   :  { %v1155_v48 = vpop.f32.mrb[34].mxu1  ;;  %912 = vxpose.xlu0.b32.cont [5/16] (narrow) %v862_v45, 8  ;;  %v878_v57 = vadd.f32 %v996_v34, %v877_v47 }
 0x2e8   :  { %v880_v49 = vpop.f32.mrb[35].mxu1  ;;  %v889_v60 = vadd.f32 %v1155_v48, %v996_v34 }
 0x2e9   :  { %v881_v58 = vadd.f32 %v996_v34, %v880_v49 }
 0x2eb   :  { %913 = vxpose.xlu0.b32.cont [6/16] (narrow) %v865_v50, 8 }
 0x2ed   :  { %v1158_v52 = vpop.f32.mrb[36].mxu1 }
 0x2ee   :  { %v893_v53 = vpop.f32.mrb[37].mxu1  ;;  %v902_v63 = vadd.f32 %v1158_v52, %v996_v34 }
 0x2ef   :  { %v1159_v54 = vpop.f32.mrb[38].mxu1  ;;  %914 = vxpose.xlu0.b32.cont [7/16] (narrow) %v870_v51, 8  ;;  %v894_v61 = vadd.f32 %v996_v34, %v893_v53 }
 0x2f0   :  { %v896_v55 = vpop.f32.mrb[39].mxu1  ;;  %v905_v0 = vadd.f32 %v1159_v54, %v996_v34 }
 0x2f1   :  { %v897_v62 = vadd.f32 %v996_v34, %v896_v55 }
 0x2f3   :  { %915 = vxpose.xlu0.b32.cont [8/16] (narrow) %v873_v56, 8 }
 0x2f7   :  { %916 = vxpose.xlu0.b32.cont [9/16] (narrow) %v878_v57, 8 }
 0x2fb   :  { %917 = vxpose.xlu0.b32.cont [10/16] (narrow) %v881_v58, 8 }
 0x2ff   :  { %918 = vxpose.xlu0.b32.cont [11/16] (narrow) %v886_v59, 8 }
 0x303   :  { %919 = vxpose.xlu0.b32.cont [12/16] (narrow) %v889_v60, 8 }
 0x307   :  { %920 = vxpose.xlu0.b32.cont [13/16] (narrow) %v894_v61, 8 }
 0x30b   :  { %921 = vxpose.xlu0.b32.cont [14/16] (narrow) %v897_v62, 8 }
 0x30f   :  { %922 = vxpose.xlu0.b32.cont [15/16] (narrow) %v902_v63, 8 }
 0x313   :  { %923 = vxpose.xlu0.b32.end [16/16] (narrow) %v905_v0, 8 }
 0x357   :  { %v924_v1 = vpop.trf.xlu0 }
 0x358   :  { %940 = vst [vmem:[#allocation2] sm:$0xff] %v924_v1 }
 0x359   :  { %1295 = shalt.err (!%p1292_p4)
}
 0x35a   :  { %s1296_s25 = scalar_lea.hbm %s1651_s11, 128 }
 0x35b   :  { %p1297_p5 = scmp.ne.s32.totalorder %s1651_s11, %s1296_s25  ;;  %p1300_p6 = scmp.lt.u32.totalorder %s1296_s25, %s1651_s11 }
 0x35d   :  { %p1302_p7 = pnand %p1300_p6, %p1297_p5 }
 0x35f   :  { %1305 = shalt.err (!%p1302_p7)
}
 0x360   :  { %950 = dma.vmem_to_hbm [thread:$0]  %s948_s21, 128, %s1651_s11, [#allocation3]  }
 0x361   :  { %1306 = dma.done.wait [#allocation3], 128  }
 0x362   :  { %1307 = vsyncadd [#allocation3], 4294967168 }
 0x363   :  { %954 = vsyncpa [#allocation3], 1 }

</bundles_post_ra>
